<compile_context>
chip_gen: v7x
topology: tpu7x:2x2x1
jax: 0.10.0
libtpu: 0.0.40
codegen_flags: <defaults>
</compile_context>

<pallas_src>
import functools
import math

import jax
import jax.numpy as jnp
from jax.experimental import pallas as pl
from jax.experimental.pallas import tpu as pltpu

LANE = 128
SUBLANE = 8

# Target HBM payload per grid step (sum over the three inputs). ~9 MiB keeps
# the ~0.35 us per-step pipeline overhead at a few percent even at v7x HBM
# bandwidth, while leaving VMEM headroom for the f32 intermediates.
_TARGET_STEP_BYTES = 9 * 1024 * 1024
_MAX_TILE_ROWS = 8192
_VMEM_LIMIT_BYTES = 40 * 1024 * 1024


def _mask_l1_kernel(pred_ref, gt_ref, mask_ref, num_ref, den_ref, *,
                    rows, tile_rows, interleave, needs_mask):
    i = pl.program_id(0)

    # Per-tile upcast to f32 (free filler under the DMA; exact accumulation).
    p = pred_ref[...].astype(jnp.float32)
    g = gt_ref[...].astype(jnp.float32)
    m = mask_ref[...].astype(jnp.float32)

    masked_abs = jnp.abs(p - g) * m

    if needs_mask:
        # The last grid step's block sticks out past `rows`; that region holds
        # unspecified data.  Zero BOTH the numerator term and the denominator
        # term there (masking only `m` is not enough: garbage |p-g| could be
        # inf/nan and inf * 0 = nan).
        row = i * tile_rows + jax.lax.broadcasted_iota(
            jnp.int32, (tile_rows, LANE), 0)
        valid = row < rows
        masked_abs = jnp.where(valid, masked_abs, 0.0)
        m = jnp.where(valid, m, 0.0)

    # Vreg-shaped partial reduction:
    #   (tile_rows, 128) -> (tile_rows/(8*ilv), ilv, 8, 128), sum leading axis.
    # Gives `interleave` independent full-vreg VPU add chains per accumulator
    # (no XLU, no scalar RMW), folded by one short final sum.
    grp = (-1, interleave, SUBLANE, LANE)
    num_ref[0] = masked_abs.reshape(grp).sum(axis=0).sum(axis=0)
    den_ref[0] = m.reshape(grp).sum(axis=0).sum(axis=0)


def mask_l1_loss(pred, gt, mask, *, eps=1e-6):
    """(|pred - gt| * mask).sum() / (mask.sum() + eps), as an f32 scalar.

    Inputs may have any (matching) shape and dtypes; pass `mask` as bool/int8
    to cut HBM traffic ~25% -- the kernel upcasts per tile.
    """
    assert pred.shape == gt.shape == mask.shape
    total = math.prod(pred.shape)
    assert total > 0

    rows = pl.cdiv(total, LANE)

    def to_slab(x):
        xf = x.reshape(-1)
        if total % LANE:
            # Rare path (element count not divisible by 128): small tail pad.
            # Pad values are irrelevant: zero mask contributes nothing.
            # TODO(synk): avoid this full-copy pad for non-128-multiple sizes.
            xf = jnp.pad(xf, (0, rows * LANE - total))
        return xf.reshape(rows, LANE)   # free view for contiguous inputs

    pred2, gt2, mask2 = to_slab(pred), to_slab(gt), to_slab(mask)

    # Size tiles by bytes so narrow-dtype inputs keep the same per-step DMA.
    per_row_bytes = LANE * (pred.dtype.itemsize + gt.dtype.itemsize
                            + mask.dtype.itemsize)
    budget_rows = max(_TARGET_STEP_BYTES // per_row_bytes, 4 * SUBLANE)
    budget_rows = min(budget_rows, _MAX_TILE_ROWS)
    budget_rows = (budget_rows // (4 * SUBLANE)) * (4 * SUBLANE)

    rows_r8 = ((rows + SUBLANE - 1) // SUBLANE) * SUBLANE
    tile_rows = min(budget_rows, rows_r8)

    n_tiles = pl.cdiv(rows, tile_rows)
    needs_mask = (n_tiles * tile_rows) != rows

    # Largest of 4/2/1 dividing tile_rows//8 -> number of independent chains.
    sub_blocks = tile_rows // SUBLANE
    interleave = 4 if sub_blocks % 4 == 0 else (2 if sub_blocks % 2 == 0 else 1)

    in_spec = pl.BlockSpec((tile_rows, LANE), lambda i: (i, 0))
    out_spec = pl.BlockSpec((1, SUBLANE, LANE), lambda i: (i, 0, 0))
    part_shape = jax.ShapeDtypeStruct((n_tiles, SUBLANE, LANE), jnp.float32)

    bytes_accessed = (
        total * (pred.dtype.itemsize + gt.dtype.itemsize + mask.dtype.itemsize)
        + 2 * n_tiles * SUBLANE * LANE * 4)

    num_parts, den_parts = pl.pallas_call(
        functools.partial(_mask_l1_kernel, rows=rows, tile_rows=tile_rows,
                          interleave=interleave, needs_mask=needs_mask),
        out_shape=(part_shape, part_shape),
        grid_spec=pltpu.PrefetchScalarGridSpec(
            num_scalar_prefetch=0,
            grid=(n_tiles,),
            in_specs=[in_spec, in_spec, in_spec],
            out_specs=[out_spec, out_spec],
        ),
        compiler_params=pltpu.CompilerParams(
            dimension_semantics=("parallel",),
            vmem_limit_bytes=_VMEM_LIMIT_BYTES,
        ),
        cost_estimate=pl.CostEstimate(
            flops=5 * total,
            transcendentals=0,
            bytes_accessed=int(bytes_accessed),
        ),
    )(pred2, gt2, mask2)

    # Tiny XLA epilogue: cross-lane reduce of the per-tile partials + divide.
    num = jnp.sum(num_parts)
    den = jnp.sum(den_parts)
    return num / (den + eps)


def mask_l1_loss_ref(pred, gt, mask, eps=1e-6):
    p = pred.astype(jnp.float32)
    g = gt.astype(jnp.float32)
    m = mask.astype(jnp.float32)
    return (jnp.abs(p - g) * m).sum() / (m.sum() + eps)


if __name__ == "__main__":
    key = jax.random.PRNGKey(0)
    k1, k2, k3 = jax.random.split(key, 3)

    B, C, H, W = 2, 4, 16, 16  # NCHW, 2048 elements total
    pred = jax.random.normal(k1, (B, C, H, W), dtype=jnp.float32)
    gt = jax.random.normal(k2, (B, C, H, W), dtype=jnp.float32)
    mask = (jax.random.uniform(k3, (B, C, H, W)) > 0.5).astype(jnp.float32)

    loss = jax.block_until_ready(mask_l1_loss(pred, gt, mask))

    ref = mask_l1_loss_ref(pred, gt, mask)
    assert jnp.allclose(loss, ref, rtol=1e-5, atol=1e-5), (loss, ref)
    print("KERNEL_OK")
</pallas_src>

<mosaic_0001>
module attributes {stable_mosaic.version = 11 : i64} {
  func.func @_mask_l1_kernel(%arg0: i32, %arg1: memref<16x128xf32, #tpu.memory_space<vmem>>, %arg2: memref<16x128xf32, #tpu.memory_space<vmem>>, %arg3: memref<16x128xf32, #tpu.memory_space<vmem>>, %arg4: memref<1x8x128xf32, #tpu.memory_space<vmem>>, %arg5: memref<1x8x128xf32, #tpu.memory_space<vmem>>) attributes {dimension_semantics = [#tpu.dimension_semantics<parallel>], iteration_bounds = array<i64: 1>, scalar_prefetch = 0 : i64, scratch_operands = 0 : i64, tpu.core_type = #tpu.core_type<tc>, window_params = [{transform_indices = @transform_0, window_bounds = array<i64: 16, 128>}, {transform_indices = @transform_1, window_bounds = array<i64: 16, 128>}, {transform_indices = @transform_2, window_bounds = array<i64: 16, 128>}, {transform_indices = @transform_3, window_bounds = array<i64: 1, 8, 128>}, {transform_indices = @transform_4, window_bounds = array<i64: 1, 8, 128>}]} {
    %c0 = arith.constant 0 : index
    %c0_0 = arith.constant 0 : index
    %0 = vector.load %arg1[%c0, %c0_0] : memref<16x128xf32, #tpu.memory_space<vmem>>, vector<16x128xf32>
    %c0_1 = arith.constant 0 : index
    %c0_2 = arith.constant 0 : index
    %1 = vector.load %arg2[%c0_1, %c0_2] : memref<16x128xf32, #tpu.memory_space<vmem>>, vector<16x128xf32>
    %c0_3 = arith.constant 0 : index
    %c0_4 = arith.constant 0 : index
    %2 = vector.load %arg3[%c0_3, %c0_4] : memref<16x128xf32, #tpu.memory_space<vmem>>, vector<16x128xf32>
    %3 = arith.subf %0, %1 : vector<16x128xf32>
    %4 = math.absf %3 : vector<16x128xf32>
    %5 = arith.mulf %4, %2 : vector<16x128xf32>
    %6 = vector.shape_cast %5 : vector<16x128xf32> to vector<1x2x8x128xf32>
    %cst = arith.constant dense<0.000000e+00> : vector<2x8x128xf32>
    %7 = vector.multi_reduction <add>, %6, %cst [0] : vector<1x2x8x128xf32> to vector<2x8x128xf32>
    %cst_5 = arith.constant dense<0.000000e+00> : vector<8x128xf32>
    %8 = vector.multi_reduction <add>, %7, %cst_5 [0] : vector<2x8x128xf32> to vector<8x128xf32>
    %c0_6 = arith.constant 0 : index
    %c0_7 = arith.constant 0 : index
    %c0_8 = arith.constant 0 : index
    %9 = vector.load %arg4[%c0_6, %c0_7, %c0_8] : memref<1x8x128xf32, #tpu.memory_space<vmem>>, vector<1x8x128xf32>
    %10 = vector.shape_cast %9 : vector<1x8x128xf32> to vector<8x128xf32>
    %11 = vector.shape_cast %8 : vector<8x128xf32> to vector<1x8x128xf32>
    tpu.vector_store %arg4[%c0_6, %c0_7, %c0_8], %11 {strides = array<i32>} : memref<1x8x128xf32, #tpu.memory_space<vmem>>, vector<1x8x128xf32>,
    %12 = vector.shape_cast %2 : vector<16x128xf32> to vector<1x2x8x128xf32>
    %cst_9 = arith.constant dense<0.000000e+00> : vector<2x8x128xf32>
    %13 = vector.multi_reduction <add>, %12, %cst_9 [0] : vector<1x2x8x128xf32> to vector<2x8x128xf32>
    %cst_10 = arith.constant dense<0.000000e+00> : vector<8x128xf32>
    %14 = vector.multi_reduction <add>, %13, %cst_10 [0] : vector<2x8x128xf32> to vector<8x128xf32>
    %c0_11 = arith.constant 0 : index
    %c0_12 = arith.constant 0 : index
    %c0_13 = arith.constant 0 : index
    %15 = vector.load %arg5[%c0_11, %c0_12, %c0_13] : memref<1x8x128xf32, #tpu.memory_space<vmem>>, vector<1x8x128xf32>
    %16 = vector.shape_cast %15 : vector<1x8x128xf32> to vector<8x128xf32>
    %17 = vector.shape_cast %14 : vector<8x128xf32> to vector<1x8x128xf32>
    tpu.vector_store %arg5[%c0_11, %c0_12, %c0_13], %17 {strides = array<i32>} : memref<1x8x128xf32, #tpu.memory_space<vmem>>, vector<1x8x128xf32>,
    return
  }
  func.func @transform_0(%arg0: i32) -> (i32, i32) {
    %c0_i32 = arith.constant 0 : i32
    %c0_i32_0 = arith.constant 0 : i32
    return %arg0, %c0_i32 : i32, i32
  }
  func.func @transform_1(%arg0: i32) -> (i32, i32) {
    %c0_i32 = arith.constant 0 : i32
    %c0_i32_0 = arith.constant 0 : i32
    return %arg0, %c0_i32 : i32, i32
  }
  func.func @transform_2(%arg0: i32) -> (i32, i32) {
    %c0_i32 = arith.constant 0 : i32
    %c0_i32_0 = arith.constant 0 : i32
    return %arg0, %c0_i32 : i32, i32
  }
  func.func @transform_3(%arg0: i32) -> (i32, i32, i32) {
    %c0_i32 = arith.constant 0 : i32
    %c0_i32_0 = arith.constant 0 : i32
    %c0_i32_1 = arith.constant 0 : i32
    return %arg0, %c0_i32, %c0_i32_0 : i32, i32, i32
  }
  func.func @transform_4(%arg0: i32) -> (i32, i32, i32) {
    %c0_i32 = arith.constant 0 : i32
    %c0_i32_0 = arith.constant 0 : i32
    %c0_i32_1 = arith.constant 0 : i32
    return %arg0, %c0_i32, %c0_i32_0 : i32, i32, i32
  }
}

</mosaic_0001>

<bundles_post_ra>
// kernel: tpu_custom_call.1
= control target key start
LH: loop header
LB: loop body
LE: loop exit
PB: predicated region body
PF: predicated region fallthrough
CT: control target
= control target key end

     0   :  { %10 = vsyncpa [#allocation3], 0  ;;  %s342_s0 = inlined_call_operand.hbm [shape: f32[16,128], index: 0, kind: input, shape index: {}]   ;;  %s343_s1 = inlined_call_operand.hbm [shape: f32[16,128], index: 1, kind: input, shape index: {}]   ;;  %s344_s2 = inlined_call_operand.hbm [shape: f32[16,128], index: 2, kind: input, shape index: {}]   ;;  %s345_s3 = inlined_call_operand.hbm [shape: f32[1,8,128], index: 3, kind: output, shape index: {0}]   ;;  %s346_s4 = inlined_call_operand.hbm [shape: f32[1,8,128], index: 4, kind: output, shape index: {1}]  }
   0x1   :  { %11 = vsyncpa [#allocation6], 0 }
   0x2   :  { %12 = vsyncpa [#allocation4], 0 }
   0x3   :  { %13 = vsyncpa [#allocation10], 0  ;;  %s234_s15 = smov [#allocation5]   ;;  %s235_s17 = smov [#allocation2]  }
   0x4   :  { %s31_s16 = sshll.u32 %s234_s15, 4  ;;  %s19_s18 = sshll.u32 %s235_s17, 4  ;;  %s32_s16 = int_to_ptr.vmem [resolvable:$true] %s31_s16  ;;  %s266_s18 = int_to_ptr.vmem [resolvable:$true] %s19_s18 }
   0x5   :  { %s116_s21 = scalar_lea.hbm %s343_s1, 256 }
   0x6   :  { %p117_p0 = scmp.ne.s32.totalorder %s343_s1, %s116_s21  ;;  %p120_p1 = scmp.lt.u32.totalorder %s116_s21, %s343_s1 }
   0x8   :  { %p122_p2 = pnand %p120_p1, %p117_p0 }
   0xa   :  { %125 = shalt.err (!%p122_p2)
}
   0xb   :  { %s126_s26 = scalar_lea.vmem %s32_s16, 256  ;;  %p131_p4 = scmp.lt.s32.totalorder %s32_s16, %s32_s16 }
   0xc   :  { %p127_p3 = scmp.ne.s32.totalorder %s32_s16, %s126_s26  ;;  %p132_p5 = scmp.lt.s32.totalorder %s126_s26, %s126_s26 }
   0xe   :  { %p133_p6 = por %p132_p5, %p131_p4 }
  0x10   :  { %p134_p7 = pnand %p133_p6, %p127_p3 }
  0x12   :  { %137 = shalt.err (!%p134_p7)
}
  0x13   :  { %s236_s27 = smov 128   ;;  %s237_s28 = smov 8  }
  0x14   :  { %37 = dma.hbm_to_vmem [thread:$0]  %s343_s1, 256, %s32_s16, [#allocation6], %s236_s27, %s236_s27, %s237_s28  }
  0x15   :  { %s138_s7 = scalar_lea.hbm %s342_s0, 256 }
  0x16   :  { %p139_p8 = scmp.ne.s32.totalorder %s342_s0, %s138_s7  ;;  %p142_p9 = scmp.lt.u32.totalorder %s138_s7, %s342_s0 }
  0x18   :  { %p144_p10 = pnand %p142_p9, %p139_p8 }
  0x1a   :  { %147 = shalt.err (!%p144_p10)
}
  0x1b   :  { %s148_s12 = scalar_lea.vmem %s266_s18, 256  ;;  %p153_p12 = scmp.lt.s32.totalorder %s266_s18, %s266_s18 }
  0x1c   :  { %p149_p11 = scmp.ne.s32.totalorder %s266_s18, %s148_s12  ;;  %p154_p13 = scmp.lt.s32.totalorder %s148_s12, %s148_s12 }
  0x1e   :  { %p155_p0 = por %p154_p13, %p153_p12 }
  0x20   :  { %p156_p1 = pnand %p155_p0, %p149_p11 }
  0x22   :  { %159 = shalt.err (!%p156_p1)
}
  0x23   :  { %25 = dma.hbm_to_vmem [thread:$0]  %s342_s0, 256, %s266_s18, [#allocation3], %s236_s27, %s236_s27, %s237_s28  }
  0x24   :  { %s238_s14 = smov [#allocation7]   ;;  %s160_s19 = scalar_lea.hbm %s344_s2, 256 }
  0x25   :  { %s43_s15 = sshll.u32 %s238_s14, 4  ;;  %p161_p2 = scmp.ne.s32.totalorder %s344_s2, %s160_s19  ;;  %s44_s15 = int_to_ptr.vmem [resolvable:$true] %s43_s15 }
  0x26   :  { %p164_p3 = scmp.lt.u32.totalorder %s160_s19, %s344_s2 }
  0x28   :  { %p166_p4 = pnand %p164_p3, %p161_p2 }
  0x2a   :  { %169 = shalt.err (!%p166_p4)
}
  0x2b   :  { %s170_s24 = scalar_lea.vmem %s44_s15, 256  ;;  %p175_p6 = scmp.lt.s32.totalorder %s44_s15, %s44_s15 }
  0x2c   :  { %p171_p5 = scmp.ne.s32.totalorder %s44_s15, %s170_s24  ;;  %p176_p7 = scmp.lt.s32.totalorder %s170_s24, %s170_s24 }
  0x2e   :  { %p177_p8 = por %p176_p7, %p175_p6 }
  0x30   :  { %p178_p9 = pnand %p177_p8, %p171_p5 }
  0x32   :  { %181 = shalt.err (!%p178_p9)
}
  0x33   :  { %49 = dma.hbm_to_vmem [thread:$0]  %s344_s2, 256, %s44_s15, [#allocation6], %s236_s27, %s236_s27, %s237_s28  }
  0x34   :  { %226 = dma.done.wait [#allocation3], 256  }
  0x35   :  { %227 = vsyncadd [#allocation3], 4294967040 }
  0x36   :  { %228 = dma.done.wait [#allocation6], 512  }
  0x37   :  { %229 = vsyncadd [#allocation6], 4294966784  ;;  %s239_s25 = smov [#allocation9]   ;;  %v59_v0 = vld [vmem:[#allocation2] sm:$0xff]  ;;  %v60_v1 = vld [vmem:[#allocation2 + $0x8] sm:$0xff]  ;;  %s240_s2 = smov [#allocation8]  }
  0x38   :  { %s95_s26 = sshll.u32 %s239_s25, 4  ;;  %v61_v2 = vld [vmem:[#allocation5] sm:$0xff]  ;;  %v62_v3 = vld [vmem:[#allocation5 + $0x8] sm:$0xff]  ;;  %v63_v4 = vld [vmem:[#allocation7] sm:$0xff]  ;;  %s85_s27 = sshll.u32 %s240_s2, 4  ;;  %s96_s26 = int_to_ptr.vmem [resolvable:$true] %s95_s26  ;;  %s86_s27 = int_to_ptr.vmem [resolvable:$true] %s85_s27 }
  0x39   :  { %v64_v5 = vld [vmem:[#allocation7 + $0x8] sm:$0xff]  ;;  %v65_v6 = vsub.f32 %v59_v0, %v61_v2  ;;  %v66_v7 = vsub.f32 %v60_v1, %v62_v3  ;;  %s182_s28 = scalar_lea.vmem %s96_s26, 128  ;;  %p187_p11 = scmp.lt.s32.totalorder %s96_s26, %s96_s26 }
  0x3a   :  { %v77_v8 = vadd.f32 %v64_v5, %v63_v4  ;;  %p183_p10 = scmp.ne.s32.totalorder %s96_s26, %s182_s28  ;;  %p188_p12 = scmp.lt.s32.totalorder %s182_s28, %s182_s28 }
  0x3b   :  { %v67_v9 = vand.u32 2147483647, %v65_v6  ;;  %v68_v10 = vand.u32 2147483647, %v66_v7 }
  0x3c   :  { %78 = vst [vmem:[#allocation9] sm:$0xff] %v77_v8  ;;  %p189_p13 = por %p188_p12, %p187_p11 }
  0x3d   :  { %v69_v11 = vmul.f32 %v67_v9, %v63_v4 }
  0x3e   :  { %p190_p0 = pnand %p189_p13, %p183_p10 }
  0x40   :  { %193 = shalt.err (!%p190_p0)
}
  0x41   :  { %s194_s5 = scalar_lea.hbm %s346_s4, 128 }
  0x42   :  { %p195_p1 = scmp.ne.s32.totalorder %s346_s4, %s194_s5  ;;  %p198_p2 = scmp.lt.u32.totalorder %s194_s5, %s346_s4 }
  0x44   :  { %p200_p3 = pnand %p198_p2, %p195_p1 }
  0x46   :  { %203 = shalt.err (!%p200_p3)
}
  0x47   :  { %98 = dma.vmem_to_hbm [thread:$0]  %s96_s26, 128, %s346_s4, [#allocation10]   ;;  %v70_v12 = vmul.f32 %v68_v10, %v64_v5 }
  0x48   :  { %s204_s12 = scalar_lea.vmem %s86_s27, 128  ;;  %p209_p5 = scmp.lt.s32.totalorder %s86_s27, %s86_s27 }
  0x49   :  { %v73_v13 = vadd.f32 %v70_v12, %v69_v11  ;;  %p205_p4 = scmp.ne.s32.totalorder %s86_s27, %s204_s12  ;;  %p210_p6 = scmp.lt.s32.totalorder %s204_s12, %s204_s12 }
  0x4b   :  { %74 = vst [vmem:[#allocation8] sm:$0xff] %v73_v13  ;;  %p211_p7 = por %p210_p6, %p209_p5 }
  0x4d   :  { %p212_p8 = pnand %p211_p7, %p205_p4 }
  0x4f   :  { %215 = shalt.err (!%p212_p8)
}
  0x50   :  { %s216_s14 = scalar_lea.hbm %s345_s3, 128 }
  0x51   :  { %p217_p9 = scmp.ne.s32.totalorder %s345_s3, %s216_s14  ;;  %p220_p10 = scmp.lt.u32.totalorder %s216_s14, %s345_s3 }
  0x53   :  { %p222_p11 = pnand %p220_p10, %p217_p9 }
  0x55   :  { %225 = shalt.err (!%p222_p11)
}
  0x56   :  { %88 = dma.vmem_to_hbm [thread:$0]  %s86_s27, 128, %s345_s3, [#allocation4]  }
  0x57   :  { %230 = dma.done.wait [#allocation4], 128  }
  0x58   :  { %231 = vsyncadd [#allocation4], 4294967168 }
  0x59   :  { %232 = dma.done.wait [#allocation10], 128  }
  0x5a   :  { %233 = vsyncadd [#allocation10], 4294967168 }
  0x5b   :  { %105 = vsyncpa [#allocation3], 1 }
  0x5c   :  { %106 = vsyncpa [#allocation6], 1 }
  0x5d   :  { %107 = vsyncpa [#allocation4], 1 }
  0x5e   :  { %108 = vsyncpa [#allocation10], 1 }

</bundles_post_ra>
